<compile_context>
chip_gen: v5e
topology: v5e:2x2
jax: 0.10.0
libtpu: 0.0.40
codegen_flags: <defaults>
</compile_context>

<pallas_src>
import functools

import numpy as np
import jax
import jax.numpy as jnp
from jax.experimental import pallas as pl
from jax.experimental.pallas import tpu as pltpu


# Normalize(mean=(0.5, 0.5, 0.5), std=(0.5, 0.5, 0.5)) from the module.
_MEAN = 0.5
_STD = 0.5


# ---------------------------------------------------------------------------
# bilinear interpolation as a weight matrix (matches F.interpolate,
# mode='bilinear', align_corners=False: half-pixel centers, edge clamped)
# ---------------------------------------------------------------------------
def _bilinear_matrix_np(in_size: int, out_size: int) -> np.ndarray:
    dst = np.arange(out_size, dtype=np.float64)
    scale = in_size / out_size
    src = np.maximum((dst + 0.5) * scale - 0.5, 0.0)      # PyTorch clamps src < 0 to 0
    i0 = np.clip(np.floor(src).astype(np.int64), 0, in_size - 1)
    i1 = np.minimum(i0 + 1, in_size - 1)
    frac = src - i0
    w = np.zeros((out_size, in_size), np.float64)
    rows = np.arange(out_size)
    w[rows, i0] += 1.0 - frac
    w[rows, i1] += frac                                    # i0 == i1 at the edge -> still sums to 1
    return w                                               # [out_size, in_size]


# ---------------------------------------------------------------------------
# kernels (two matmul orders; picked statically by the wrapper)
# ---------------------------------------------------------------------------
def _kernel_col_first(x_ref, wh_ref, wwt_ref, scale_ref, bias_ref, o_ref):
    # x_ref:    (Bblk, C, Hin, Win)   VMEM, native input dtype
    # wh_ref:   (TH, Hin)             VMEM, bf16, shared across channels
    # wwt_ref:  (Win, Wout)           VMEM, bf16
    # scale_ref/(C,) bias_ref:(C,)    SMEM, f32  (1/std, -mean/std)
    # o_ref:    (Bblk, C, TH, Wout)   VMEM, f32
    bblk, C, Hin, Win = x_ref.shape
    # stage 1: column interp -- all images & channels batched into ONE MXU matmul
    x2 = x_ref[...].reshape(bblk * C * Hin, Win).astype(jnp.bfloat16)
    t = jnp.dot(x2, wwt_ref[...], preferred_element_type=jnp.float32)      # (Bblk*C*Hin, Wout)
    t = t.astype(jnp.bfloat16)
    wh = wh_ref[...]
    # stage 2: row interp + fused Normalize epilogue (lane-dense stores)
    for b in range(bblk):
        for c in range(C):
            r0 = (b * C + c) * Hin
            y = jnp.dot(wh, t[r0:r0 + Hin, :], preferred_element_type=jnp.float32)
            o_ref[b, c] = y * scale_ref[c] + bias_ref[c]


def _kernel_row_first(x_ref, wh_ref, wwt_ref, scale_ref, bias_ref, o_ref):
    # Same refs as _kernel_col_first, but the Hin-contraction (row interp with
    # the per-tile wh) runs first so the intermediate is (TH, Win) per channel;
    # the Win-contraction is then batched across all images & channels.
    bblk, C, Hin, Win = x_ref.shape
    TH = wh_ref.shape[0]
    wh = wh_ref[...]
    parts = []
    for b in range(bblk):
        for c in range(C):
            xc = x_ref[b, c].astype(jnp.bfloat16)                          # (Hin, Win)
            parts.append(
                jnp.dot(wh, xc, preferred_element_type=jnp.float32)
                .astype(jnp.bfloat16))                                     # (TH, Win)
    t = jnp.concatenate(parts, axis=0)                                     # (Bblk*C*TH, Win)
    y = jnp.dot(t, wwt_ref[...], preferred_element_type=jnp.float32)       # (Bblk*C*TH, Wout)
    for b in range(bblk):
        for c in range(C):
            r0 = (b * C + c) * TH
            o_ref[b, c] = y[r0:r0 + TH, :] * scale_ref[c] + bias_ref[c]


def _padded_bytes(shape, itemsize):
    # (8,128)-padded VMEM footprint estimate for one buffer
    s = list(shape)
    s[-1] = -(-s[-1] // 128) * 128
    if len(s) >= 2:
        s[-2] = -(-s[-2] // 8) * 8
    n = 1
    for d in s:
        n *= d
    return n * itemsize


# ---------------------------------------------------------------------------
# wrapper
# ---------------------------------------------------------------------------
@functools.partial(jax.jit, static_argnames=("size", "bblk", "h_tiles", "order"))
def siglip_processor_forward(x, *, size, bblk=None, h_tiles=None, order=None):
    """Siglip_Processor: bilinear resize (align_corners=False) to `size`, then (x-0.5)/0.5."""
    B, C, Hin, Win = x.shape
    Hout, Wout = size
    x_itemsize = jnp.dtype(x.dtype).itemsize

    # ---- static trace-time setup (numpy constants; no jnp scatter ops) ----
    wh = jnp.asarray(_bilinear_matrix_np(Hin, Hout), jnp.bfloat16)         # (Hout, Hin)
    wwt = jnp.asarray(_bilinear_matrix_np(Win, Wout).T, jnp.bfloat16)      # (Win, Wout)
    scale = jnp.full((C,), 1.0 / _STD, jnp.float32)                        # 1/std
    bias = jnp.full((C,), -_MEAN / _STD, jnp.float32)                      # -mean/std

    # ---- block / tiling heuristics (all static) ----
    if bblk is None:                       # block several small images per grid step
        bblk = 1
        for cand in range(B, 0, -1):       # largest divisor giving <= ~2 MiB input blocks
            if B % cand == 0 and cand * C * Hin * Win * x_itemsize <= (2 << 20):
                bblk = cand
                break
    if B % bblk != 0:
        raise ValueError("bblk must divide the batch size")
    n_bblk = B // bblk

    if h_tiles is None:                    # Hout-tile axis: megacore work even at one batch block
        h_tiles = 2 if (n_bblk < 2 and Hout % 16 == 0) else 1
    TH = Hout // h_tiles
    if Hout % h_tiles != 0 or (h_tiles > 1 and TH % 8 != 0):
        raise ValueError("h_tiles must split Hout into multiples of 8")

    if order is None:
        # contract the more-downsampled axis first -> smallest intermediate;
        # with Hout tiling, row-first avoids recomputing the column stage per tile.
        if h_tiles > 1:
            order = "row_first"
        else:
            order = "col_first" if Hin * Wout <= Hout * Win else "row_first"
    kernel = _kernel_col_first if order == "col_first" else _kernel_row_first

    # ---- VMEM budget from the actual (vreg-padded, double-buffered) blocks ----
    blk_in = _padded_bytes((bblk, C, Hin, Win), x_itemsize)
    blk_out = _padded_bytes((bblk, C, TH, Wout), 4)
    w_bytes = _padded_bytes((TH, Hin), 2) + _padded_bytes((Win, Wout), 2)
    interm = (_padded_bytes((bblk * C * Hin, Win), 2)                          # bf16 copy of x block
              + _padded_bytes((bblk * C * max(Hin, TH), max(Win, Wout)), 6)    # stage-1 result f32+bf16
              + 2 * _padded_bytes((TH, Wout), 4))                              # epilogue tiles
    vmem_limit = int(min(64 << 20, 2 * (blk_in + blk_out + w_bytes) + interm + (8 << 20)))

    flops = 2 * B * C * Wout * Hin * (Win + Hout)          # both matmul stages
    bytes_accessed = (B * C * Hin * Win * x_itemsize       # x read once, native dtype
                      + B * C * Hout * Wout * 4            # f32 output
                      + (Hout * Hin + Win * Wout) * 2      # bf16 interp matrices
                      + 2 * C * 4)                         # SMEM scale/bias

    return pl.pallas_call(
        kernel,
        out_shape=jax.ShapeDtypeStruct((B, C, Hout, Wout), jnp.float32),
        grid=(n_bblk, h_tiles),
        in_specs=[
            pl.BlockSpec((bblk, C, Hin, Win), lambda b, h: (b, 0, 0, 0)),
            pl.BlockSpec((TH, Hin), lambda b, h: (h, 0)),
            # wwt's block index is constant -> Pallas fetches it once and keeps it resident.
            pl.BlockSpec((Win, Wout), lambda b, h: (0, 0)),
            pl.BlockSpec(memory_space=pltpu.MemorySpace.SMEM),   # scale = 1/std
            pl.BlockSpec(memory_space=pltpu.MemorySpace.SMEM),   # bias  = -mean/std
        ],
        out_specs=pl.BlockSpec((bblk, C, TH, Wout), lambda b, h: (b, 0, h, 0)),
        compiler_params=pltpu.CompilerParams(
            dimension_semantics=("parallel", "parallel"),
            vmem_limit_bytes=vmem_limit,
        ),
        cost_estimate=pl.CostEstimate(
            flops=flops, transcendentals=0, bytes_accessed=bytes_accessed),
    )(x, wh, wwt, scale, bias)


# ---------------------------------------------------------------------------
# pure-JAX f32 reference (same separable-matmul semantics) for correctness
# ---------------------------------------------------------------------------
def _reference(x, size):
    B, C, Hin, Win = x.shape
    Hout, Wout = size
    wh = jnp.asarray(_bilinear_matrix_np(Hin, Hout), jnp.float32)
    ww = jnp.asarray(_bilinear_matrix_np(Win, Wout), jnp.float32)
    y = jnp.einsum("oh,bchw,pw->bcop", wh, x.astype(jnp.float32), ww)
    return (y - _MEAN) / _STD


# ---------------------------------------------------------------------------
if __name__ == "__main__":
    key = jax.random.PRNGKey(0)
    # NCHW image batch in [0, 1]; 3 channels (the module's Normalize is 3-channel).
    x = jax.random.uniform(key, (2, 3, 16, 16), dtype=jnp.float32)
    # small stand-in for SigLIP's (224, 224); 128 keeps the demo output lane-dense.
    size = (128, 128)

    ref = _reference(x, size)

    # default config: both images blocked into one grid step, Hout split into two
    # parallel tiles (megacore), row-first matmul order.
    out = siglip_processor_forward(x, size=size)
    jax.block_until_ready(out)
    assert out.shape == (2, 3, 128, 128)
    err = float(jnp.max(jnp.abs(out - ref)))
    assert err < 3e-2, f"max abs error {err}"     # bf16 MXU operands -> relaxed tolerance

    # also exercise the column-first / one-image-per-step configuration.
    out2 = siglip_processor_forward(x, size=size, bblk=1, h_tiles=1)
    jax.block_until_ready(out2)
    err2 = float(jnp.max(jnp.abs(out2 - ref)))
    assert err2 < 3e-2, f"max abs error {err2}"

    print("KERNEL_OK")
</pallas_src>

<mosaic_0001>
module attributes {stable_mosaic.version = 11 : i64} {
  func.func @_kernel_row_first(%arg0: i32, %arg1: i32, %arg2: memref<2x3x16x16xf32, #tpu.memory_space<vmem>>, %arg3: memref<64x16xbf16, #tpu.memory_space<vmem>>, %arg4: memref<16x128xbf16, #tpu.memory_space<vmem>>, %arg5: memref<3xf32, #tpu.memory_space<smem>>, %arg6: memref<3xf32, #tpu.memory_space<smem>>, %arg7: memref<2x3x64x128xf32, #tpu.memory_space<vmem>>) attributes {dimension_semantics = [#tpu.dimension_semantics<parallel>, #tpu.dimension_semantics<parallel>], iteration_bounds = array<i64: 1, 2>, scalar_prefetch = 0 : i64, scratch_operands = 0 : i64, tpu.core_type = #tpu.core_type<tc>, window_params = [{transform_indices = @transform_0, window_bounds = array<i64: 2, 3, 16, 16>}, {transform_indices = @transform_1, window_bounds = array<i64: 64, 16>}, {pipeline_mode = #tpu.pipeline_mode<synchronous>, transform_indices = @transform_2, window_bounds = array<i64: 16, 128>}, {transform_indices = @transform_3, window_bounds = array<i64: 3>}, {transform_indices = @transform_4, window_bounds = array<i64: 3>}, {transform_indices = @transform_5, window_bounds = array<i64: 2, 3, 64, 128>}]} {
    %c0 = arith.constant 0 : index
    %c0_0 = arith.constant 0 : index
    %0 = vector.load %arg3[%c0, %c0_0] : memref<64x16xbf16, #tpu.memory_space<vmem>>, vector<64x16xbf16>
    %c0_1 = arith.constant 0 : index
    %c0_2 = arith.constant 0 : index
    %c0_3 = arith.constant 0 : index
    %c0_4 = arith.constant 0 : index
    %1 = vector.load %arg2[%c0_1, %c0_2, %c0_3, %c0_4] : memref<2x3x16x16xf32, #tpu.memory_space<vmem>>, vector<1x1x16x16xf32>
    %2 = vector.shape_cast %1 : vector<1x1x16x16xf32> to vector<16x16xf32>
    %3 = arith.truncf %2 : vector<16x16xf32> to vector<16x16xbf16>
    %cst = arith.constant dense<0.000000e+00> : vector<64x16xf32>
    %4 = tpu.matmul %0, %3, %cst {dimension_numbers = #tpu.dot_dimension_numbers<[1], [0], [0], [1], [0, 0, 1, 1], [], []>} : vector<64x16xbf16>, vector<16x16xbf16>, vector<64x16xf32> -> vector<64x16xf32>
    %5 = arith.truncf %4 : vector<64x16xf32> to vector<64x16xbf16>
    %c0_5 = arith.constant 0 : index
    %c1 = arith.constant 1 : index
    %c0_6 = arith.constant 0 : index
    %c0_7 = arith.constant 0 : index
    %6 = vector.load %arg2[%c0_5, %c1, %c0_6, %c0_7] : memref<2x3x16x16xf32, #tpu.memory_space<vmem>>, vector<1x1x16x16xf32>
    %7 = vector.shape_cast %6 : vector<1x1x16x16xf32> to vector<16x16xf32>
    %8 = arith.truncf %7 : vector<16x16xf32> to vector<16x16xbf16>
    %cst_8 = arith.constant dense<0.000000e+00> : vector<64x16xf32>
    %9 = tpu.matmul %0, %8, %cst_8 {dimension_numbers = #tpu.dot_dimension_numbers<[1], [0], [0], [1], [0, 0, 1, 1], [], []>} : vector<64x16xbf16>, vector<16x16xbf16>, vector<64x16xf32> -> vector<64x16xf32>
    %10 = arith.truncf %9 : vector<64x16xf32> to vector<64x16xbf16>
    %c0_9 = arith.constant 0 : index
    %c2 = arith.constant 2 : index
    %c0_10 = arith.constant 0 : index
    %c0_11 = arith.constant 0 : index
    %11 = vector.load %arg2[%c0_9, %c2, %c0_10, %c0_11] : memref<2x3x16x16xf32, #tpu.memory_space<vmem>>, vector<1x1x16x16xf32>
    %12 = vector.shape_cast %11 : vector<1x1x16x16xf32> to vector<16x16xf32>
    %13 = arith.truncf %12 : vector<16x16xf32> to vector<16x16xbf16>
    %cst_12 = arith.constant dense<0.000000e+00> : vector<64x16xf32>
    %14 = tpu.matmul %0, %13, %cst_12 {dimension_numbers = #tpu.dot_dimension_numbers<[1], [0], [0], [1], [0, 0, 1, 1], [], []>} : vector<64x16xbf16>, vector<16x16xbf16>, vector<64x16xf32> -> vector<64x16xf32>
    %15 = arith.truncf %14 : vector<64x16xf32> to vector<64x16xbf16>
    %c1_13 = arith.constant 1 : index
    %c0_14 = arith.constant 0 : index
    %c0_15 = arith.constant 0 : index
    %c0_16 = arith.constant 0 : index
    %16 = vector.load %arg2[%c1_13, %c0_14, %c0_15, %c0_16] : memref<2x3x16x16xf32, #tpu.memory_space<vmem>>, vector<1x1x16x16xf32>
    %17 = vector.shape_cast %16 : vector<1x1x16x16xf32> to vector<16x16xf32>
    %18 = arith.truncf %17 : vector<16x16xf32> to vector<16x16xbf16>
    %cst_17 = arith.constant dense<0.000000e+00> : vector<64x16xf32>
    %19 = tpu.matmul %0, %18, %cst_17 {dimension_numbers = #tpu.dot_dimension_numbers<[1], [0], [0], [1], [0, 0, 1, 1], [], []>} : vector<64x16xbf16>, vector<16x16xbf16>, vector<64x16xf32> -> vector<64x16xf32>
    %20 = arith.truncf %19 : vector<64x16xf32> to vector<64x16xbf16>
    %c1_18 = arith.constant 1 : index
    %c1_19 = arith.constant 1 : index
    %c0_20 = arith.constant 0 : index
    %c0_21 = arith.constant 0 : index
    %21 = vector.load %arg2[%c1_18, %c1_19, %c0_20, %c0_21] : memref<2x3x16x16xf32, #tpu.memory_space<vmem>>, vector<1x1x16x16xf32>
    %22 = vector.shape_cast %21 : vector<1x1x16x16xf32> to vector<16x16xf32>
    %23 = arith.truncf %22 : vector<16x16xf32> to vector<16x16xbf16>
    %cst_22 = arith.constant dense<0.000000e+00> : vector<64x16xf32>
    %24 = tpu.matmul %0, %23, %cst_22 {dimension_numbers = #tpu.dot_dimension_numbers<[1], [0], [0], [1], [0, 0, 1, 1], [], []>} : vector<64x16xbf16>, vector<16x16xbf16>, vector<64x16xf32> -> vector<64x16xf32>
    %25 = arith.truncf %24 : vector<64x16xf32> to vector<64x16xbf16>
    %c1_23 = arith.constant 1 : index
    %c2_24 = arith.constant 2 : index
    %c0_25 = arith.constant 0 : index
    %c0_26 = arith.constant 0 : index
    %26 = vector.load %arg2[%c1_23, %c2_24, %c0_25, %c0_26] : memref<2x3x16x16xf32, #tpu.memory_space<vmem>>, vector<1x1x16x16xf32>
    %27 = vector.shape_cast %26 : vector<1x1x16x16xf32> to vector<16x16xf32>
    %28 = arith.truncf %27 : vector<16x16xf32> to vector<16x16xbf16>
    %cst_27 = arith.constant dense<0.000000e+00> : vector<64x16xf32>
    %29 = tpu.matmul %0, %28, %cst_27 {dimension_numbers = #tpu.dot_dimension_numbers<[1], [0], [0], [1], [0, 0, 1, 1], [], []>} : vector<64x16xbf16>, vector<16x16xbf16>, vector<64x16xf32> -> vector<64x16xf32>
    %30 = arith.truncf %29 : vector<64x16xf32> to vector<64x16xbf16>
    %31 = tpu.concatenate %5, %10, %15, %20, %25, %30 in 0 : vector<64x16xbf16>, vector<64x16xbf16>, vector<64x16xbf16>, vector<64x16xbf16>, vector<64x16xbf16>, vector<64x16xbf16> -> vector<384x16xbf16>
    %c0_28 = arith.constant 0 : index
    %c0_29 = arith.constant 0 : index
    %32 = vector.load %arg4[%c0_28, %c0_29] : memref<16x128xbf16, #tpu.memory_space<vmem>>, vector<16x128xbf16>
    %cst_30 = arith.constant dense<0.000000e+00> : vector<384x128xf32>
    %33 = tpu.matmul %31, %32, %cst_30 {dimension_numbers = #tpu.dot_dimension_numbers<[1], [0], [0], [1], [0, 0, 1, 1], [], []>} : vector<384x16xbf16>, vector<16x128xbf16>, vector<384x128xf32> -> vector<384x128xf32>
    %34 = vector.extract_strided_slice %33 {offsets = [0, 0], sizes = [64, 128], strides = [1, 1]} : vector<384x128xf32> to vector<64x128xf32>
    %c0_31 = arith.constant 0 : index
    %35 = memref.load %arg5[%c0_31] : memref<3xf32, #tpu.memory_space<smem>>
    %36 = vector.broadcast %35 : f32 to vector<64x128xf32>
    %37 = arith.mulf %34, %36 : vector<64x128xf32>
    %c0_32 = arith.constant 0 : index
    %38 = memref.load %arg6[%c0_32] : memref<3xf32, #tpu.memory_space<smem>>
    %39 = vector.broadcast %38 : f32 to vector<64x128xf32>
    %40 = arith.addf %37, %39 : vector<64x128xf32>
    %c0_33 = arith.constant 0 : index
    %c0_34 = arith.constant 0 : index
    %c0_35 = arith.constant 0 : index
    %c0_36 = arith.constant 0 : index
    %41 = vector.load %arg7[%c0_33, %c0_34, %c0_35, %c0_36] : memref<2x3x64x128xf32, #tpu.memory_space<vmem>>, vector<1x1x64x128xf32>
    %42 = vector.shape_cast %41 : vector<1x1x64x128xf32> to vector<64x128xf32>
    %43 = vector.shape_cast %40 : vector<64x128xf32> to vector<1x1x64x128xf32>
    tpu.vector_store %arg7[%c0_33, %c0_34, %c0_35, %c0_36], %43 {strides = array<i32>} : memref<2x3x64x128xf32, #tpu.memory_space<vmem>>, vector<1x1x64x128xf32>,
    %44 = vector.extract_strided_slice %33 {offsets = [64, 0], sizes = [64, 128], strides = [1, 1]} : vector<384x128xf32> to vector<64x128xf32>
    %c1_37 = arith.constant 1 : index
    %45 = memref.load %arg5[%c1_37] : memref<3xf32, #tpu.memory_space<smem>>
    %46 = vector.broadcast %45 : f32 to vector<64x128xf32>
    %47 = arith.mulf %44, %46 : vector<64x128xf32>
    %c1_38 = arith.constant 1 : index
    %48 = memref.load %arg6[%c1_38] : memref<3xf32, #tpu.memory_space<smem>>
    %49 = vector.broadcast %48 : f32 to vector<64x128xf32>
    %50 = arith.addf %47, %49 : vector<64x128xf32>
    %c0_39 = arith.constant 0 : index
    %c1_40 = arith.constant 1 : index
    %c0_41 = arith.constant 0 : index
    %c0_42 = arith.constant 0 : index
    %51 = vector.load %arg7[%c0_39, %c1_40, %c0_41, %c0_42] : memref<2x3x64x128xf32, #tpu.memory_space<vmem>>, vector<1x1x64x128xf32>
    %52 = vector.shape_cast %51 : vector<1x1x64x128xf32> to vector<64x128xf32>
    %53 = vector.shape_cast %50 : vector<64x128xf32> to vector<1x1x64x128xf32>
    tpu.vector_store %arg7[%c0_39, %c1_40, %c0_41, %c0_42], %53 {strides = array<i32>} : memref<2x3x64x128xf32, #tpu.memory_space<vmem>>, vector<1x1x64x128xf32>,
    %54 = vector.extract_strided_slice %33 {offsets = [128, 0], sizes = [64, 128], strides = [1, 1]} : vector<384x128xf32> to vector<64x128xf32>
    %c2_43 = arith.constant 2 : index
    %55 = memref.load %arg5[%c2_43] : memref<3xf32, #tpu.memory_space<smem>>
    %56 = vector.broadcast %55 : f32 to vector<64x128xf32>
    %57 = arith.mulf %54, %56 : vector<64x128xf32>
    %c2_44 = arith.constant 2 : index
    %58 = memref.load %arg6[%c2_44] : memref<3xf32, #tpu.memory_space<smem>>
    %59 = vector.broadcast %58 : f32 to vector<64x128xf32>
    %60 = arith.addf %57, %59 : vector<64x128xf32>
    %c0_45 = arith.constant 0 : index
    %c2_46 = arith.constant 2 : index
    %c0_47 = arith.constant 0 : index
    %c0_48 = arith.constant 0 : index
    %61 = vector.load %arg7[%c0_45, %c2_46, %c0_47, %c0_48] : memref<2x3x64x128xf32, #tpu.memory_space<vmem>>, vector<1x1x64x128xf32>
    %62 = vector.shape_cast %61 : vector<1x1x64x128xf32> to vector<64x128xf32>
    %63 = vector.shape_cast %60 : vector<64x128xf32> to vector<1x1x64x128xf32>
    tpu.vector_store %arg7[%c0_45, %c2_46, %c0_47, %c0_48], %63 {strides = array<i32>} : memref<2x3x64x128xf32, #tpu.memory_space<vmem>>, vector<1x1x64x128xf32>,
    %64 = vector.extract_strided_slice %33 {offsets = [192, 0], sizes = [64, 128], strides = [1, 1]} : vector<384x128xf32> to vector<64x128xf32>
    %c0_49 = arith.constant 0 : index
    %65 = memref.load %arg5[%c0_49] : memref<3xf32, #tpu.memory_space<smem>>
    %66 = vector.broadcast %65 : f32 to vector<64x128xf32>
    %67 = arith.mulf %64, %66 : vector<64x128xf32>
    %c0_50 = arith.constant 0 : index
    %68 = memref.load %arg6[%c0_50] : memref<3xf32, #tpu.memory_space<smem>>
    %69 = vector.broadcast %68 : f32 to vector<64x128xf32>
    %70 = arith.addf %67, %69 : vector<64x128xf32>
    %c1_51 = arith.constant 1 : index
    %c0_52 = arith.constant 0 : index
    %c0_53 = arith.constant 0 : index
    %c0_54 = arith.constant 0 : index
    %71 = vector.load %arg7[%c1_51, %c0_52, %c0_53, %c0_54] : memref<2x3x64x128xf32, #tpu.memory_space<vmem>>, vector<1x1x64x128xf32>
    %72 = vector.shape_cast %71 : vector<1x1x64x128xf32> to vector<64x128xf32>
    %73 = vector.shape_cast %70 : vector<64x128xf32> to vector<1x1x64x128xf32>
    tpu.vector_store %arg7[%c1_51, %c0_52, %c0_53, %c0_54], %73 {strides = array<i32>} : memref<2x3x64x128xf32, #tpu.memory_space<vmem>>, vector<1x1x64x128xf32>,
    %74 = vector.extract_strided_slice %33 {offsets = [256, 0], sizes = [64, 128], strides = [1, 1]} : vector<384x128xf32> to vector<64x128xf32>
    %c1_55 = arith.constant 1 : index
    %75 = memref.load %arg5[%c1_55] : memref<3xf32, #tpu.memory_space<smem>>
    %76 = vector.broadcast %75 : f32 to vector<64x128xf32>
    %77 = arith.mulf %74, %76 : vector<64x128xf32>
    %c1_56 = arith.constant 1 : index
    %78 = memref.load %arg6[%c1_56] : memref<3xf32, #tpu.memory_space<smem>>
    %79 = vector.broadcast %78 : f32 to vector<64x128xf32>
    %80 = arith.addf %77, %79 : vector<64x128xf32>
    %c1_57 = arith.constant 1 : index
    %c1_58 = arith.constant 1 : index
    %c0_59 = arith.constant 0 : index
    %c0_60 = arith.constant 0 : index
    %81 = vector.load %arg7[%c1_57, %c1_58, %c0_59, %c0_60] : memref<2x3x64x128xf32, #tpu.memory_space<vmem>>, vector<1x1x64x128xf32>
    %82 = vector.shape_cast %81 : vector<1x1x64x128xf32> to vector<64x128xf32>
    %83 = vector.shape_cast %80 : vector<64x128xf32> to vector<1x1x64x128xf32>
    tpu.vector_store %arg7[%c1_57, %c1_58, %c0_59, %c0_60], %83 {strides = array<i32>} : memref<2x3x64x128xf32, #tpu.memory_space<vmem>>, vector<1x1x64x128xf32>,
    %84 = vector.extract_strided_slice %33 {offsets = [320, 0], sizes = [64, 128], strides = [1, 1]} : vector<384x128xf32> to vector<64x128xf32>
    %c2_61 = arith.constant 2 : index
    %85 = memref.load %arg5[%c2_61] : memref<3xf32, #tpu.memory_space<smem>>
    %86 = vector.broadcast %85 : f32 to vector<64x128xf32>
    %87 = arith.mulf %84, %86 : vector<64x128xf32>
    %c2_62 = arith.constant 2 : index
    %88 = memref.load %arg6[%c2_62] : memref<3xf32, #tpu.memory_space<smem>>
    %89 = vector.broadcast %88 : f32 to vector<64x128xf32>
    %90 = arith.addf %87, %89 : vector<64x128xf32>
    %c1_63 = arith.constant 1 : index
    %c2_64 = arith.constant 2 : index
    %c0_65 = arith.constant 0 : index
    %c0_66 = arith.constant 0 : index
    %91 = vector.load %arg7[%c1_63, %c2_64, %c0_65, %c0_66] : memref<2x3x64x128xf32, #tpu.memory_space<vmem>>, vector<1x1x64x128xf32>
    %92 = vector.shape_cast %91 : vector<1x1x64x128xf32> to vector<64x128xf32>
    %93 = vector.shape_cast %90 : vector<64x128xf32> to vector<1x1x64x128xf32>
    tpu.vector_store %arg7[%c1_63, %c2_64, %c0_65, %c0_66], %93 {strides = array<i32>} : memref<2x3x64x128xf32, #tpu.memory_space<vmem>>, vector<1x1x64x128xf32>,
    return
  }
  func.func @transform_0(%arg0: i32, %arg1: i32) -> (i32, i32, i32, i32) {
    %c0_i32 = arith.constant 0 : i32
    %c0_i32_0 = arith.constant 0 : i32
    %c0_i32_1 = arith.constant 0 : i32
    %c0_i32_2 = arith.constant 0 : i32
    return %arg0, %c0_i32, %c0_i32_0, %c0_i32_1 : i32, i32, i32, i32
  }
  func.func @transform_1(%arg0: i32, %arg1: i32) -> (i32, i32) {
    %c0_i32 = arith.constant 0 : i32
    %c0_i32_0 = arith.constant 0 : i32
    return %arg1, %c0_i32 : i32, i32
  }
  func.func @transform_2(%arg0: i32, %arg1: i32) -> (i32, i32) {
    %c0_i32 = arith.constant 0 : i32
    %c0_i32_0 = arith.constant 0 : i32
    %c0_i32_1 = arith.constant 0 : i32
    return %c0_i32, %c0_i32_0 : i32, i32
  }
  func.func @transform_3(%arg0: i32, %arg1: i32) -> i32 {
    %c0_i32 = arith.constant 0 : i32
    %c0_i32_0 = arith.constant 0 : i32
    return %c0_i32 : i32
  }
  func.func @transform_4(%arg0: i32, %arg1: i32) -> i32 {
    %c0_i32 = arith.constant 0 : i32
    %c0_i32_0 = arith.constant 0 : i32
    return %c0_i32 : i32
  }
  func.func @transform_5(%arg0: i32, %arg1: i32) -> (i32, i32, i32, i32) {
    %c0_i32 = arith.constant 0 : i32
    %c0_i32_0 = arith.constant 0 : i32
    %c0_i32_1 = arith.constant 0 : i32
    return %arg0, %c0_i32, %arg1, %c0_i32_0 : i32, i32, i32, i32
  }
}

</mosaic_0001>

<bundles_post_ra>
// kernel: siglip_processor_forward.1
= control target key start
LH: loop header
LB: loop body
LE: loop exit
PB: predicated region body
PF: predicated region fallthrough
CT: control target
= control target key end

     0   :  { %s2267_s0 = inlined_call_operand.hbm [shape: f32[2,3,16,16], index: 0, kind: input, shape index: {}]   ;;  %s2268_s1 = inlined_call_operand.hbm [shape: bf16[128,16], index: 1, kind: input, shape index: {}]   ;;  %s2269_s2 = inlined_call_operand.hbm [shape: bf16[16,128], index: 2, kind: input, shape index: {}]   ;;  %s2270_s3 = inlined_call_operand.vmem [shape: f32[3], index: 3, kind: input, shape index: {}]   ;;  %s2271_s4 = inlined_call_operand.vmem [shape: f32[3], index: 4, kind: input, shape index: {}]   ;;  %s2272_s5 = inlined_call_operand.hbm [shape: f32[2,3,128,128], index: 5, kind: output, shape index: {}]  }
   0x1   :  { %2275 = sst [smem:[#allocation21_spill]] %s2267_s0 }
   0x2   :  { %2276 = sst [smem:[#allocation22_spill]] %s2269_s2 }
   0x3   :  { %2277 = sst [smem:[#allocation23_spill]] %s2270_s3 }
   0x4   :  { %10 = vsyncpa [#allocation3], 0 }
   0x5   :  { %11 = vsyncpa [#allocation7], 0 }
   0x6   :  { %13 = vsyncpa [#allocation7 + $0x1], 0 }
   0x7   :  { %14 = vsyncpa [#allocation5], 0 }
   0x8   :  { %15 = vsyncpa [#allocation11], 0 }
   0x9   :  { %16 = vsyncpa [#allocation4], 0 }
   0xa   :  { %18 = vsyncpa [#allocation4 + $0x1], 0  ;;  %s1794_s18 = smov 0   ;;  %s1796_s19 = smov 0  }
   0xb   :  { %s1798_s20 = smov 0   ;;  %s1800_s21 = smov 0  }
   0xc   :  { %s1802_s22 = smov 0   ;;  %s1804_s23 = smov 0  }
   0xd LB: > { %s1825_s24 = sadd.s32 4294967295, %s1748_s23   ;;  %s1293_s25 = sadd.s32 4294967294, %s1748_s23   ;;  %s1748_s23 = sphi %s1804_s23, %s24_s23   ;;  %s1744_s22 = sphi %s1802_s22, %s2293_s22   ;;  %s1740_s21 = sphi %s1800_s21, %s2292_s21   ;;  %s1736_s20 = sphi %s1798_s20, %s2291_s20   ;;  %s1732_s19 = sphi %s1796_s19, %s2290_s19   ;;  %s1728_s18 = sphi %s1794_s18, %s2289_s18  }
   0xe   : > { %p82_p0 = scmp.ne.s32.totalorder %s1732_s19, %s1728_s18  ;;  %p83_p1 = scmp.eq.s32.totalorder %s1825_s24, 0 }
   0xf   : > { %p171_p2 = scmp.eq.s32.totalorder %s1825_s24, 1  ;;  %p177_p3 = scmp.eq.s32.totalorder %s1293_s25, 1 }
  0x10   : > { %p1834_p4 = por %p83_p1, %p82_p0  ;;  %p1294_p5 = scmp.ge.s32.totalorder %s1748_s23, 1 }
  0x11   : > { %p1839_p6 = por %p177_p3, %p82_p0  ;;  %p184_p7 = scmp.lt.s32.totalorder %s1748_s23, 3 }
  0x12   : > { %s2280_s2 = sld [smem:[#allocation22_spill]]  ;;  %s1750_s7 = smov [#allocation8]  }
  0x13   : > { %p1847_p8 = pnand %p1294_p5, %p184_p7  ;;  %s215_s8 = sshll.u32 %s1750_s7, 4  ;;  %s216_s8 = int_to_ptr.vmem [resolvable:$true] %s215_s8 }
  0x14   : > { %p1299_p11 = scmp.ge.s32.totalorder %s1748_s23, 2  ;;  %s2283_s0 = sld [smem:[#allocation21_spill]] }
  0x15   : > { %p1465_p9 = pneg %p1847_p8  ;;  %s2273_s13 = smov 64  }
  0x16   : > { %s2274_s14 = smov 4   ;;  %s1753_s15 = smov [#allocation2]  }
  0x17   : > { %p1855_p10 = pnand %p1465_p9, %p83_p1  ;;  %s201_s16 = sshll.u32 %s1753_s15, 4  ;;  %s202_s16 = int_to_ptr.vmem [resolvable:$true] %s201_s16 }
  0x18   : > { %s213_s30 = sshll.u32 %s2280_s2, 4  ;;  %s1754_s17 = smov 128   ;;  %s214_s30 = int_to_ptr.hbm [resolvable:$true] %s213_s30 }
  0x19   : > { %1471 = dma.hbm_to_vmem [thread:$0]  (!%p1855_p10), %s214_s30, 128, %s216_s8, [#allocation7], %s2273_s13, %s2273_s13, %s2274_s14  }
  0x1a   : > { %s199_s12 = sshll.u32 %s2283_s0, 4  ;;  %s1755_s25 = smov 8   ;;  %s200_s12 = int_to_ptr.hbm [resolvable:$true] %s199_s12 }
  0x1b   : > { %1468 = dma.hbm_to_vmem [thread:$0]  (!%p1855_p10), %s200_s12, 1536, %s202_s16, [#allocation3], %s1754_s17, %s1754_s17, %s1755_s25  }
  0x1c   : > { %s2284_s3 = sld [smem:[#allocation23_spill]]  ;;  %s238_s10 = sshll.u32 %s2271_s4, 4  ;;  %s239_s10 = int_to_ptr.vmem [resolvable:$true] %s238_s10 }
  0x1d   : > { %s1756_s11 = smov [#allocation9]   ;;  %s1757_s15 = smov [#allocation10]  }
  0x1e   : > { %1477 = dma.vmem_to_smem (!%p1855_p10), %s239_s10, 16, %s1757_s15, [#allocation11]  }
  0x1f   : > { %s33_s12 = sadd.s32 1, %s1744_s22  ;;  %s69_s16 = sadd.s32 1, %s1736_s20 }
  0x20   : > { %p34_p12 = scmp.ge.s32.totalorder %s33_s12, 2  ;;  %p76_p13 = scmp.ne.s32.totalorder %s1736_s20, %s1732_s19 }
  0x21   : > { %p77_p0 = scmp.eq.s32.totalorder %s1748_s23, 0  ;;  %p1490_p3 = scmp.lt.s32.totalorder %s1748_s23, 2 }
  0x22   : > { %s228_s7 = sshll.u32 %s2284_s3, 4  ;;  %s2295_s12 = smov (%p34_p12, %s33_s12), 0  ;;  %s229_s7 = int_to_ptr.vmem [resolvable:$true] %s228_s7 }
  0x23   : > { %1474 = dma.vmem_to_smem (!%p1855_p10), %s229_s7, 16, %s1756_s11, [#allocation5]  }
  0x24   : > { %p1888_p5 = por %p77_p0, %p76_p13  ;;  %p1894_p7 = por %p171_p2, %p76_p13 }
  0x25   : > { %s66_s25 = ssub.s32 %s1744_s22, %s2295_s12  ;;  %s249_s28 = sand.u32 1, %s1748_s23  }
  0x26   : > { %p67_p9 = scmp.eq.s32.totalorder %s66_s25, 0  ;;  %s251_s29 = sand.u32 1, %s1736_s20  }
  0x27   : > { %s1429_s7 = sshll.u32 %s1744_s22, 5  ;;  %s1300_s8 = sshll.u32 %s251_s29, 5 }
  0x28   : > { %s1904_s30 = scalar_select %p67_p9, %s1736_s20, %s69_s16  }
  0x29   : > { %s258_s15 = scalar_lea.hbm %s2268_s1, %s1429_s7  ;;  %s253_s14 = scalar_lea.vmem [#allocation6], %s1300_s8 }
  0x2a   : > { %s259_s13 = sshll.u32 %s258_s15, 4  ;;  %s261_s0 = sshll.u32 %s253_s14, 4  ;;  %s260_s13 = int_to_ptr.hbm [resolvable:$true] %s259_s13  ;;  %s262_s0 = int_to_ptr.vmem [resolvable:$true] %s261_s0 }
  0x2b   : > { %p1479_p2 = pnand %p1490_p3, %p1888_p5  ;;  %s250_s2 = scalar_lea.sflag [#allocation7], %s249_s28 }
  0x2c   : > { %s2287_s3 = smov 4   ;;  %s2288_s25 = smov 64  }
  0x2d   : > { %1481 = dma.hbm_to_vmem [thread:$0]  (!%p1479_p2), %s260_s13, 512, %s262_s0, %s250_s2, %s2288_s25, %s2288_s25, %s2287_s3  }
  0x2e   : > { %273 = sbr.rel (%p1847_p8) target bundleno = 605 (0x25d), region = 40 }
  0x33   : > { %1703 = dma.done.wait (%p83_p1), [#allocation3], 1536  }
  0x34   : > { %1705 = vsyncadd (%p83_p1), [#allocation3], 4294965760  ;;  %s280_s14 = sand.u32 1, %s1825_s24   ;;  %s1924_s16 = sand.u32 1, %s1732_s19  }
  0x35   : > { %s1305_s17 = sshll.u32 %s1924_s16, 5  ;;  %s281_s28 = scalar_lea.sflag [#allocation7], %s280_s14 }
  0x36   : > { %s1927_s29 = scalar_lea.vmem [#allocation6], %s1305_s17 }
  0x37   : > { %1707 = dma.done.wait (%p1834_p4), %s281_s28, 512  }
  0x38   : > { %1709 = vsyncadd (%p1834_p4), %s281_s28, 4294966784 }
  0x39   : > { %1711 = dma.done.wait (%p83_p1), [#allocation7], 128  }
  0x3a   : > { %1713 = vsyncadd (%p83_p1), [#allocation7], 4294967168 }
  0x3b   : > { %1715 = dma.done.wait (%p83_p1), [#allocation5], 16  }
  0x3c   : > { %1717 = vsyncadd (%p83_p1), [#allocation5], 4294967280 }
  0x3d   : > { %1719 = dma.done.wait (%p83_p1), [#allocation11], 16  }
  0x3e   : > { %1721 = vsyncadd (%p83_p1), [#allocation11], 4294967280 }
  0x3f   : > { %305 = sfence }
  0x40   : > { %v341_v0 = vld [vmem:[#allocation2] sm:$0xff]  ;;  %v342_v1 = vld [vmem:[#allocation2 + $0x8] sm:$0xff]  ;;  %v497_v3 = vld [vmem:[#allocation2 + $0x30] sm:$0xff]  ;;  %vm364_vm0 = vcmask 130048   ;;  %s948_s0 = sld [smem:[#allocation9]]  ;;  %s1438_s3 = smul.u32 384, %s1924_s16 }
  0x41   : > { %v343_v2 = vpack.c.bf16 %v342_v1, %v341_v0  ;;  %v498_v4 = vld [vmem:[#allocation2 + $0x38] sm:$0xff]  ;;  %v415_v5 = vld [vmem:[#allocation2 + $0x10] sm:$0xff]  ;;  %v1430_v6 = vld [vmem:[%s1927_s29] sm:$0xff]  ;;  %s958_s2 = sld [smem:[#allocation10]]  ;;  %s1122_s8 = scalar_lea.sflag [#allocation4], %s1924_s16 }
  0x42   : > { %v499_v7 = vpack.c.bf16 %v498_v4, %v497_v3  ;;  %v416_v8 = vld [vmem:[#allocation2 + $0x18] sm:$0xff]  ;;  %v1431_v10 = vld [vmem:[%s1927_s29 + $0x8] sm:$0xff]  ;;  %v1952_v11 = vld [vmem:[%s1927_s29 + $0x10] sm:$0xff]  ;;  %s2049_s24 = scalar_lea.vmem [#allocation12], %s1438_s3  ;;  %s1377_s26 = sld [smem:[#allocation9 + $0x1]] }
  0x43   : > { %384 = vmatpush.bf16.msra.mxu0 %v343_v2  ;;  %v417_v9 = vpack.c.bf16 %v416_v8, %v415_v5  ;;  %v538_v12 = vld [vmem:[#allocation2 + $0x40] sm:$0xff]  ;;  %v539_v13 = vld [vmem:[#allocation2 + $0x48] sm:$0xff]  ;;  %v579_v14 = vld [vmem:[#allocation2 + $0x50] sm:$0xff]  ;;  %s1378_s6 = sld [smem:[#allocation10 + $0x1]] }
  0x44   : > { %v540_v15 = vpack.c.bf16 %v539_v13, %v538_v12  ;;  %v580_v16 = vld [vmem:[#allocation2 + $0x58] sm:$0xff]  ;;  %v1434_v19 = vld [vmem:[#allocation8] sm:$0xff]  ;;  %v457_v24 = vld [vmem:[#allocation2 + $0x28] sm:$0xff]  ;;  %s1387_s13 = sld [smem:[#allocation9 + $0x2]] }
  0x45   : > { %425 = vmatpush.bf16.msra.mxu1 %v417_v9  ;;  %v581_v17 = vpack.c.bf16 %v580_v16, %v579_v14  ;;  %v1959_v18 = vld [vmem:[%s1927_s29 + $0x18] sm:$0xff]  ;;  %1437 = vmatpush.bf16.msra.mxu3 %v1434_v19  ;;  %v456_v23 = vld [vmem:[#allocation2 + $0x20] sm:$0xff]  ;;  %s1388_s7 = sld [smem:[#allocation10 + $0x2]] }
  0x46   : > { %1325 = vmatmul.msk.bf16.vlgmr.msra.gmra.mxu0 %vm364_vm0, %v1430_v6  ;;  %v458_v26 = vpack.c.bf16 %v457_v24, %v456_v23 }
  0x47   : > { %507 = vmatpush.bf16.msrb.mxu0 %v499_v7 }
  0x48   : > { %1329 = vmatmul.msk.bf16.vlgmr.msra.gmra.mxu1 %vm364_vm0, %v1430_v6  ;;  %466 = vmatpush.bf16.msra.mxu2 %v458_v26 }
  0x49   : > { %589 = vmatpush.bf16.msrb.mxu1 %v581_v17 }
  0x4b   : > { %548 = vmatpush.bf16.msra.mxu0 %v540_v15  ;;  %1333 = vmatmul.msk.bf16.vlgmr.msra.gmra.mxu2 %vm364_vm0, %v1430_v6 }
  0x4c   : > { %1436 = vmatpush.bf16.msrb.mxu2 %v1434_v19 }
  0x4d   : > { %826 = vmatpush.bf16.msra.mxu1 %v1434_v19 }
  0x56   : > { %1326 = vmatmul.msk.bf16.gmra.mxu0 %vm364_vm0, %v1431_v10 }
  0x58   : > { %1330 = vmatmul.msk.bf16.gmra.mxu1 %vm364_vm0, %v1431_v10 }
  0x5b   : > { %1334 = vmatmul.msk.bf16.gmra.mxu2 %vm364_vm0, %v1431_v10 }
  0x66   : > { %1327 = vmatmul.msk.bf16.gmra.mxu0 %vm364_vm0, %v1952_v11 }
  0x68   : > { %1331 = vmatmul.msk.bf16.gmra.mxu1 %vm364_vm0, %v1952_v11 }
  0x6b   : > { %1335 = vmatmul.msk.bf16.gmra.mxu2 %vm364_vm0, %v1952_v11 }
  0x76   : > { %1328 = vmatmul.msk.bf16.gmra.mxu0 %vm364_vm0, %v1959_v18 }
  0x78   : > { %1332 = vmatmul.msk.bf16.gmra.mxu1 %vm364_vm0, %v1959_v18 }
  0x7b   : > { %1336 = vmatmul.msk.bf16.gmra.mxu2 %vm364_vm0, %v1959_v18 }
  0x86   : > { %1337 = vmatmul.msk.bf16.vlgmr.msrb.gmra.mxu0 %vm364_vm0, %v1430_v6 }
  0x88   : > { %1345 = vmatmul.msk.bf16.vlgmr.msrb.gmra.mxu1 %vm364_vm0, %v1430_v6 }
  0x96   : > { %1338 = vmatmul.msk.bf16.gmra.mxu0 %vm364_vm0, %v1431_v10 }
  0x98   : > { %1346 = vmatmul.msk.bf16.gmra.mxu1 %vm364_vm0, %v1431_v10 }
  0xa6   : > { %1339 = vmatmul.msk.bf16.gmra.mxu0 %vm364_vm0, %v1952_v11 }
  0xa8   : > { %1347 = vmatmul.msk.bf16.gmra.mxu1 %vm364_vm0, %v1952_v11 }
  0xb6   : > { %1340 = vmatmul.msk.bf16.gmra.mxu0 %vm364_vm0, %v1959_v18 }
  0xb8   : > { %1348 = vmatmul.msk.bf16.gmra.mxu1 %vm364_vm0, %v1959_v18 }
  0xc3   : > { %v386_v20 = vpop.f32.mrf.mxu0 }
  0xc4   : > { %v406_v22 = vpack.c.bf16 %v386_v20, %v386_v20 }
  0xc5   : > { %v427_v21 = vpop.f32.mrf.mxu1 }
  0xc6   : > { %1341 = vmatmul.msk.bf16.vlgmr.msra.gmra.mxu0 %vm364_vm0, %v1430_v6  ;;  %v627_v29 = vunpack.c.l.b16 %v406_v22  ;;  %v447_v60 = vpack.c.bf16 %v427_v21, %v427_v21 }
  0xc8   : > { %v647_v63 = vunpack.c.l.b16 %v447_v60 }
  0xcb   : > { %v388_v25 = vpop.f32.mrf.mxu0 }
  0xcc   : > { %v407_v27 = vpack.c.bf16 %v388_v25, %v388_v25 }
  0xcd   : > { %v429_v28 = vpop.f32.mrf.mxu1 }
  0xce   : > { %v628_v30 = vunpack.c.l.b16 %v407_v27  ;;  %v448_v61 = vpack.c.bf16 %v429_v28, %v429_v28 }
  0xd0   : > { %v635_v31 = vpack.c.b16 %v628_v30, %v627_v29  ;;  %v648_v0 = vunpack.c.l.b16 %v448_v61 }
  0xd2   : > { %1353 = vmatmul.msk.bf16.vlgmr.msra.gmra.mxu1 %vm364_vm0, %v635_v31  ;;  %v655_v4 = vpack.c.b16 %v648_v0, %v647_v63 }
  0xd3   : > { %v391_v32 = vpop.f32.mrf.mxu0 }
  0xd4   : > { %v408_v34 = vpack.c.bf16 %v391_v32, %v391_v32  ;;  %1357 = vmatmul.msk.bf16.vlgmr.msrb.gmra.mxu2 %vm364_vm0, %v655_v4 }
  0xd5   : > { %v432_v33 = vpop.f32.mrf.mxu1 }
  0xd6   : > { %1342 = vmatmul.msk.bf16.gmra.mxu0 %vm364_vm0, %v1431_v10  ;;  %v629_v38 = vunpack.c.l.b16 %v408_v34  ;;  %v449_v15 = vpack.c.bf16 %v432_v33, %v432_v33 }
  0xdb   : > { %v393_v35 = vpop.f32.mrf.mxu0 }
  0xdc   : > { %v409_v36 = vpack.c.bf16 %v393_v35, %v393_v35 }
  0xdd   : > { %v434_v37 = vpop.f32.mrf.mxu1 }
  0xde   : > { %v630_v39 = vunpack.c.l.b16 %v409_v36  ;;  %v450_v16 = vpack.c.bf16 %v434_v37, %v434_v37 }
  0xe0   : > { %v636_v40 = vpack.c.b16 %v630_v39, %v629_v38  ;;  %v650_v19 = vunpack.c.l.b16 %v450_v16 }
  0xe2   : > { %1354 = vmatmul.msk.bf16.gmra.mxu1 %vm364_vm0, %v636_v40 }
  0xe3   : > { %v396_v41 = vpop.f32.mrf.mxu0 }
  0xe4   : > { %v410_v43 = vpack.c.bf16 %v396_v41, %v396_v41 }
  0xe5   : > { %v1983_v42 = vpop.f32.mrf.mxu1 }
  0xe6   : > { %1343 = vmatmul.msk.bf16.gmra.mxu0 %vm364_vm0, %v1952_v11  ;;  %v631_v47 = vunpack.c.l.b16 %v410_v43  ;;  %v451_v34 = vpack.c.bf16 %v1983_v42, %v1983_v42 }
  0xe8   : > { %v651_v37 = vunpack.c.l.b16 %v451_v34 }
  0xeb   : > { %v398_v44 = vpop.f32.mrf.mxu0 }
  0xec   : > { %v411_v45 = vpack.c.bf16 %v398_v44, %v398_v44 }
  0xed   : > { %v1987_v46 = vpop.f32.mrf.mxu1 }
  0xee   : > { %v632_v48 = vunpack.c.l.b16 %v411_v45  ;;  %v452_v35 = vpack.c.bf16 %v1987_v46, %v1987_v46 }
  0xf0   : > { %v637_v49 = vpack.c.b16 %v632_v48, %v631_v47  ;;  %v652_v38 = vunpack.c.l.b16 %v452_v35 }
  0xf2   : > { %1355 = vmatmul.msk.bf16.gmra.mxu1 %vm364_vm0, %v637_v49  ;;  %v657_v43 = vpack.c.b16 %v652_v38, %v651_v37 }
  0xf3   : > { %v401_v50 = vpop.f32.mrf.mxu0 }
  0xf4   : > { %v412_v52 = vpack.c.bf16 %v401_v50, %v401_v50 }
  0xf5   : > { %v1992_v51 = vpop.f32.mrf.mxu1 }
  0xf6   : > { %1344 = vmatmul.msk.bf16.gmra.mxu0 %vm364_vm0, %v1959_v18  ;;  %v633_v56 = vunpack.c.l.b16 %v412_v52  ;;  %v649_v18 = vunpack.c.l.b16 %v449_v15 }
  0xf8   : > { %v656_v23 = vpack.c.b16 %v650_v19, %v649_v18  ;;  %v2044_v18 = vstv %s958_s2 }
  0xfa   : > { %1358 = vmatmul.msk.bf16.gmra.mxu2 %vm364_vm0, %v656_v23  ;;  %v468_v23 = vpop.f32.mrf.mxu2 }
  0xfb   : > { %v403_v53 = vpop.f32.mrf.mxu0 }
  0xfc   : > { %v413_v54 = vpack.c.bf16 %v403_v53, %v403_v53 }
  0xfd   : > { %v1996_v55 = vpop.f32.mrf.mxu1 }
  0xfe   : > { %v634_v57 = vunpack.c.l.b16 %v413_v54  ;;  %v453_v54 = vpack.c.bf16 %v1992_v51, %v1992_v51 }
 0x100   : > { %v638_v58 = vpack.c.b16 %v634_v57, %v633_v56  ;;  %v454_v56 = vpack.c.bf16 %v1996_v55, %v1996_v55 }
 0x102   : > { %1356 = vmatmul.msk.bf16.gmra.mxu1 %vm364_vm0, %v638_v58  ;;  %v653_v58 = vunpack.c.l.b16 %v453_v54 }
 0x103   : > { %v509_v59 = vpop.f32.mrf.mxu0 }
 0x104   : > { %v529_v1 = vpack.c.bf16 %v509_v59, %v509_v59  ;;  %v654_v59 = vunpack.c.l.b16 %v454_v56 }
 0x105   : > { %v591_v62 = vpop.f32.mrf.mxu1 }
 0x106   : > { %v611_v2 = vpack.c.bf16 %v591_v62, %v591_v62  ;;  %v687_v7 = vunpack.c.l.b16 %v529_v1  ;;  %v658_v63 = vpack.c.b16 %v654_v59, %v653_v58 }
 0x108   : > { %v2001_v9 = vunpack.c.l.b16 %v611_v2 }
 0x10a   : > { %1359 = vmatmul.msk.bf16.gmra.mxu2 %vm364_vm0, %v657_v43 }
 0x10b   : > { %v511_v3 = vpop.f32.mrf.mxu0 }
 0x10c   : > { %v530_v5 = vpack.c.bf16 %v511_v3, %v511_v3 }
 0x10d   : > { %v593_v6 = vpop.f32.mrf.mxu1 }
 0x10e   : > { %v688_v8 = vunpack.c.l.b16 %v530_v5  ;;  %v612_v10 = vpack.c.bf16 %v593_v6, %v593_v6 }
 0x110   : > { %v695_v11 = vpack.c.b16 %v688_v8, %v687_v7  ;;  %v2003_v12 = vunpack.c.l.b16 %v612_v10 }
 0x112   : > { %1365 = vmatmul.msk.bf16.vlgmr.msra.gmra.mxu3 %vm364_vm0, %v695_v11  ;;  %v735_v13 = vpack.c.b16 %v2003_v12, %v2001_v9  ;;  %v2094_v12 = vstv %s1377_s26 }
 0x113   : > { %v514_v14 = vpop.f32.mrf.mxu0 }
 0x114   : > { %v531_v20 = vpack.c.bf16 %v514_v14, %v514_v14  ;;  %v2042_v14 = vstv %s948_s0 }
 0x115   : > { %v596_v17 = vpop.f32.mrf.mxu1 }
 0x116   : > { %v613_v21 = vpack.c.bf16 %v596_v17, %v596_v17  ;;  %v689_v26 = vunpack.c.l.b16 %v531_v20 }
 0x118   : > { %v2009_v28 = vunpack.c.l.b16 %v613_v21 }
 0x11a   : > { %1360 = vmatmul.msk.bf16.gmra.mxu2 %vm364_vm0, %v658_v63 }
 0x11b   : > { %v516_v22 = vpop.f32.mrf.mxu0 }
 0x11c   : > { %v532_v24 = vpack.c.bf16 %v516_v22, %v516_v22 }
 0x11d   : > { %v598_v25 = vpop.f32.mrf.mxu1 }
 0x11e   : > { %v690_v27 = vunpack.c.l.b16 %v532_v24  ;;  %v614_v29 = vpack.c.bf16 %v598_v25, %v598_v25 }
 0x120   : > { %v696_v30 = vpack.c.b16 %v690_v27, %v689_v26  ;;  %v2011_v31 = vunpack.c.l.b16 %v614_v29  ;;  %v488_v26 = vpack.c.bf16 %v468_v23, %v468_v23 }
 0x122   : > { %1366 = vmatmul.msk.bf16.gmra.mxu3 %vm364_vm0, %v696_v30  ;;  %v736_v32 = vpack.c.b16 %v2011_v31, %v2009_v28  ;;  %v667_v35 = vunpack.c.l.b16 %v488_v26 }
 0x123   : > { %v519_v33 = vpop.f32.mrf.mxu0 }
 0x124   : > { %v533_v39 = vpack.c.bf16 %v519_v33, %v519_v33  ;;  %v470_v33 = vpop.f32.mrf.mxu2 }
 0x125   : > { %v601_v36 = vpop.f32.mrf.mxu1 }
 0x126   : > { %v615_v40 = vpack.c.bf16 %v601_v36, %v601_v36  ;;  %v691_v47 = vunpack.c.l.b16 %v533_v39  ;;  %v489_v36 = vpack.c.bf16 %v470_v33, %v470_v33 }
 0x128   : > { %v2021_v49 = vunpack.c.l.b16 %v615_v40  ;;  %v668_v39 = vunpack.c.l.b16 %v489_v36 }
 0x12b   : > { %v521_v41 = vpop.f32.mrf.mxu0 }
 0x12c   : > { %v534_v44 = vpack.c.bf16 %v521_v41, %v521_v41 }
 0x12d   : > { %v603_v45 = vpop.f32.mrf.mxu1 }
 0x12e   : > { %v692_v48 = vunpack.c.l.b16 %v534_v44  ;;  %v616_v50 = vpack.c.bf16 %v603_v45, %v603_v45  ;;  %v675_v44 = vpack.c.b16 %v668_v39, %v667_v35 }
 0x130   : > { %v697_v52 = vpack.c.b16 %v692_v48, %v691_v47  ;;  %v2023_v53 = vunpack.c.l.b16 %v616_v50  ;;  %1361 = vmatmul.msk.bf16.gmra.mxu2 %vm364_vm0, %v675_v44  ;;  %v473_v48 = vpop.f32.mrf.mxu2 }
 0x132   : > { %1367 = vmatmul.msk.bf16.gmra.mxu3 %vm364_vm0, %v697_v52  ;;  %v737_v42 = vpack.c.b16 %v2023_v53, %v2021_v49 }
 0x133   : > { %v524_v46 = vpop.f32.mrf.mxu0 }
 0x134   : > { %v535_v60 = vpack.c.bf16 %v524_v46, %v524_v46  ;;  %v490_v46 = vpack.c.bf16 %v473_v48, %v473_v48 }
 0x135   : > { %v606_v57 = vpop.f32.mrf.mxu1 }
 0x136   : > { %v617_v61 = vpack.c.bf16 %v606_v57, %v606_v57  ;;  %v693_v2 = vunpack.c.l.b16 %v535_v60  ;;  %v669_v60 = vunpack.c.l.b16 %v490_v46 }
 0x138   : > { %v2033_v4 = vunpack.c.l.b16 %v617_v61  ;;  %v475_v58 = vpop.f32.mrf.mxu2 }
 0x139   : > { %v491_v61 = vpack.c.bf16 %v475_v58, %v475_v58 }
 0x13b   : > { %v526_v62 = vpop.f32.mrf.mxu0 }
 0x13c   : > { %v536_v0 = vpack.c.bf16 %v526_v62, %v526_v62 }
 0x13d   : > { %v608_v1 = vpop.f32.mrf.mxu1 }
 0x13e   : > { %v694_v3 = vunpack.c.l.b16 %v536_v0  ;;  %v618_v5 = vpack.c.bf16 %v608_v1, %v608_v1  ;;  %v670_v0 = vunpack.c.l.b16 %v491_v61 }
 0x140   : > { %v698_v6 = vpack.c.b16 %v694_v3, %v693_v2  ;;  %v2035_v51 = vunpack.c.l.b16 %v618_v5  ;;  %v676_v5 = vpack.c.b16 %v670_v0, %v669_v60 }
 0x142   : > { %1368 = vmatmul.msk.bf16.gmra.mxu3 %vm364_vm0, %v698_v6  ;;  %v738_v55 = vpack.c.b16 %v2035_v51, %v2033_v4  ;;  %1362 = vmatmul.msk.bf16.gmra.mxu2 %vm364_vm0, %v676_v5 }
 0x143   : > { %v550_v7 = vpop.f32.mrf.mxu0 }
 0x144   : > { %v570_v8 = vpack.c.bf16 %v550_v7, %v550_v7 }
 0x146   : > { %v707_v15 = vunpack.c.l.b16 %v570_v8  ;;  %v478_v8 = vpop.f32.mrf.mxu2 }
 0x14b   : > { %v552_v10 = vpop.f32.mrf.mxu0 }
 0x14c   : > { %v571_v11 = vpack.c.bf16 %v552_v10, %v552_v10 }
 0x14e   : > { %v708_v16 = vunpack.c.l.b16 %v571_v11 }
 0x14f   : > { %v828_v17 = vpop.f32.mrf.mxu1 }
 0x150   : > { %v715_v19 = vpack.c.b16 %v708_v16, %v707_v15  ;;  %v950_v20 = vmul.f32 %v2042_v14, %v828_v17  ;;  %v492_v15 = vpack.c.bf16 %v478_v8, %v478_v8 }
 0x152   : > { %v960_v21 = vadd.f32 %v2044_v18, %v950_v20  ;;  %1369 = vmatmul.msk.bf16.gmra.mxu3 %vm364_vm0, %v715_v19  ;;  %v480_v20 = vpop.f32.mrf.mxu2 }
 0x153   : > { %v555_v22 = vpop.f32.mrf.mxu0  ;;  %v493_v23 = vpack.c.bf16 %v480_v20, %v480_v20 }
 0x154   : > { %968 = vst [vmem:[%s2049_s24] sm:$0xff] %v960_v21  ;;  %v572_v27 = vpack.c.bf16 %v555_v22, %v555_v22  ;;  %v671_v22 = vunpack.c.l.b16 %v492_v15 }
 0x155   : > { %v672_v26 = vunpack.c.l.b16 %v493_v23 }
 0x156   : > { %v709_v37 = vunpack.c.l.b16 %v572_v27 }
 0x157   : > { %v830_v24 = vpop.f32.mrf.mxu1  ;;  %v677_v33 = vpack.c.b16 %v672_v26, %v671_v22 }
 0x158   : > { %v951_v25 = vmul.f32 %v2042_v14, %v830_v24 }
 0x159   : > { %1363 = vmatmul.msk.bf16.gmra.mxu2 %vm364_vm0, %v677_v33 }
 0x15a   : > { %v961_v29 = vadd.f32 %v2044_v18, %v951_v25  ;;  %v483_v35 = vpop.f32.mrf.mxu2 }
 0x15b   : > { %v557_v30 = vpop.f32.mrf.mxu0 }
 0x15c   : > { %969 = vst [vmem:[%s2049_s24 + $0x8] sm:$0xff] %v961_v29  ;;  %v573_v34 = vpack.c.bf16 %v557_v30, %v557_v30 }
 0x15e   : > { %v710_v38 = vunpack.c.l.b16 %v573_v34 }
 0x15f   : > { %v833_v40 = vpop.f32.mrf.mxu1 }
 0x160   : > { %v716_v41 = vpack.c.b16 %v710_v38, %v709_v37  ;;  %v952_v43 = vmul.f32 %v2042_v14, %v833_v40  ;;  %v494_v38 = vpack.c.bf16 %v483_v35, %v483_v35 }
 0x162   : > { %v962_v45 = vadd.f32 %v2044_v18, %v952_v43  ;;  %1370 = vmatmul.msk.bf16.gmra.mxu3 %vm364_vm0, %v716_v41  ;;  %v485_v40 = vpop.f32.mrf.mxu2  ;;  %v673_v41 = vunpack.c.l.b16 %v494_v38 }
 0x163   : > { %v560_v47 = vpop.f32.mrf.mxu0  ;;  %v495_v43 = vpack.c.bf16 %v485_v40, %v485_v40  ;;  %v2156_v40 = vstv %s1388_s7 }
 0x164   : > { %970 = vst [vmem:[%s2049_s24 + $0x10] sm:$0xff] %v962_v45  ;;  %v574_v54 = vpack.c.bf16 %v560_v47, %v560_v47 }
 0x165   : > { %v674_v44 = vunpack.c.l.b16 %v495_v43 }
 0x166   : > { %v711_v62 = vunpack.c.l.b16 %v574_v54 }
 0x167   : > { %v835_v50 = vpop.f32.mrf.mxu1  ;;  %v678_v45 = vpack.c.b16 %v674_v44, %v673_v41 }
 0x168   : > { %v953_v52 = vmul.f32 %v2042_v14, %v835_v50 }
 0x169   : > { %1364 = vmatmul.msk.bf16.gmra.mxu2 %vm364_vm0, %v678_v45 }
 0x16a   : > { %v963_v56 = vadd.f32 %v2044_v18, %v953_v52  ;;  %v848_v9 = vpop.f32.mrf.mxu2 }
 0x16b   : > { %v562_v57 = vpop.f32.mrf.mxu0 }
 0x16c   : > { %971 = vst [vmem:[%s2049_s24 + $0x18] sm:$0xff] %v963_v56  ;;  %v575_v59 = vpack.c.bf16 %v562_v57, %v562_v57  ;;  %v978_v56 = vmul.f32 %v2094_v12, %v848_v9 }
 0x16e   : > { %v712_v63 = vunpack.c.l.b16 %v575_v59 }
 0x16f   : > { %v838_v1 = vpop.f32.mrf.mxu1 }
 0x170   : > { %v717_v2 = vpack.c.b16 %v712_v63, %v711_v62  ;;  %v954_v3 = vmul.f32 %v2042_v14, %v838_v1 }
 0x172   : > { %v964_v6 = vadd.f32 %v2044_v18, %v954_v3  ;;  %1371 = vmatmul.msk.bf16.gmra.mxu3 %vm364_vm0, %v717_v2  ;;  %v850_v28 = vpop.f32.mrf.mxu2 }
 0x173   : > { %v565_v7 = vpop.f32.mrf.mxu0  ;;  %v979_v31 = vmul.f32 %v2094_v12, %v850_v28 }
 0x174   : > { %972 = vst [vmem:[%s2049_s24 + $0x20] sm:$0xff] %v964_v6  ;;  %v576_v16 = vpack.c.bf16 %v565_v7, %v565_v7 }
 0x176   : > { %v713_v24 = vunpack.c.l.b16 %v576_v16 }
 0x177   : > { %v840_v10 = vpop.f32.mrf.mxu1 }
 0x178   : > { %v955_v11 = vmul.f32 %v2042_v14, %v840_v10 }
 0x17a   : > { %v965_v17 = vadd.f32 %v2044_v18, %v955_v11 }
 0x17b   : > { %v567_v19 = vpop.f32.mrf.mxu0 }
 0x17c   : > { %973 = vst [vmem:[%s2049_s24 + $0x28] sm:$0xff] %v965_v17  ;;  %v577_v21 = vpack.c.bf16 %v567_v19, %v567_v19 }
 0x17d   : > { %v853_v0 = vpop.f32.mrf.mxu2 }
 0x17e   : > { %v714_v25 = vunpack.c.l.b16 %v577_v21  ;;  %v980_v1 = vmul.f32 %v2094_v12, %v853_v0 }
 0x17f   : > { %v843_v27 = vpop.f32.mrf.mxu1 }
 0x180   : > { %v718_v29 = vpack.c.b16 %v714_v25, %v713_v24  ;;  %v956_v30 = vmul.f32 %v2042_v14, %v843_v27 }
 0x182   : > { %v966_v34 = vadd.f32 %v2044_v18, %v956_v30  ;;  %1372 = vmatmul.msk.bf16.gmra.mxu3 %vm364_vm0, %v718_v29 }
 0x184   : > { %974 = vst [vmem:[%s2049_s24 + $0x30] sm:$0xff] %v966_v34 }
 0x185   : > { %v855_v7 = vpop.f32.mrf.mxu2 }
 0x186   : > { %v981_v49 = vmul.f32 %v2094_v12, %v855_v7 }
 0x187   : > { %v845_v36 = vpop.f32.mrf.mxu1 }
 0x188   : > { %v957_v37 = vmul.f32 %v2042_v14, %v845_v36 }
 0x18a   : > { %v967_v39 = vadd.f32 %v2044_v18, %v957_v37  ;;  %v2154_v37 = vstv %s1387_s13 }
 0x18c   : > { %975 = vst [vmem:[%s2049_s24 + $0x38] sm:$0xff] %v967_v39 }
 0x18d   : > { %v858_v11 = vpop.f32.mrf.mxu2 }
 0x18e   : > { %v982_v15 = vmul.f32 %v2094_v12, %v858_v11 }
 0x192   : > { %1373 = vmatmul.msk.bf16.gmra.mxu3 %vm364_vm0, %v735_v13  ;;  %v2096_v13 = vstv %s1378_s6 }
 0x193   : > { %v988_v58 = vadd.f32 %v2096_v13, %v978_v56  ;;  %v989_v61 = vadd.f32 %v2096_v13, %v979_v31  ;;  %v990_v3 = vadd.f32 %v2096_v13, %v980_v1  ;;  %v992_v17 = vadd.f32 %v2096_v13, %v982_v15 }
 0x195   : > { %v888_v47 = vpop.f32.mrf.mxu3  ;;  %1379 = vst [vmem:[%s2049_s24 + $0x40] sm:$0xff] %v988_v58  ;;  %v860_v21 = vpop.f32.mrf.mxu2 }
 0x196   : > { %v1036_v48 = vmul.f32 %v2042_v14, %v888_v47  ;;  %1380 = vst [vmem:[%s2049_s24 + $0x48] sm:$0xff] %v989_v61  ;;  %v983_v4 = vmul.f32 %v2094_v12, %v860_v21 }
 0x197   : > { %1381 = vst [vmem:[%s2049_s24 + $0x50] sm:$0xff] %v990_v3 }
 0x198   : > { %v1046_v50 = vadd.f32 %v1036_v48, %v2044_v18  ;;  %1383 = vst [vmem:[%s2049_s24 + $0x60] sm:$0xff] %v992_v17 }
 0x19a   : > { %1397 = vst [vmem:[%s2049_s24 + $0xc0] sm:$0xff] %v1046_v50 }
 0x19d   : > { %v890_v52 = vpop.f32.mrf.mxu3  ;;  %v863_v24 = vpop.f32.mrf.mxu2 }
 0x19e   : > { %v1037_v46 = vmul.f32 %v2042_v14, %v890_v52  ;;  %v984_v25 = vmul.f32 %v2094_v12, %v863_v24 }
 0x1a0   : > { %v1047_v54 = vadd.f32 %v1037_v46, %v2044_v18  ;;  %v994_v27 = vadd.f32 %v2096_v13, %v984_v25 }
 0x1a2   : > { %1398 = vst [vmem:[%s2049_s24 + $0xc8] sm:$0xff] %v1047_v54  ;;  %1374 = vmatmul.msk.bf16.gmra.mxu3 %vm364_vm0, %v736_v32 }
 0x1a3   : > { %1385 = vst [vmem:[%s2049_s24 + $0x70] sm:$0xff] %v994_v27 }
 0x1a5   : > { %v893_v57 = vpop.f32.mrf.mxu3  ;;  %v865_v33 = vpop.f32.mrf.mxu2 }
 0x1a6   : > { %v1038_v59 = vmul.f32 %v2042_v14, %v893_v57 }
 0x1a8   : > { %v1048_v60 = vadd.f32 %v1038_v59, %v2044_v18 }
 0x1aa   : > { %1399 = vst [vmem:[%s2049_s24 + $0xd0] sm:$0xff] %v1048_v60 }
 0x1ad   : > { %v895_v32 = vpop.f32.mrf.mxu3 }
 0x1ae   : > { %v1039_v62 = vmul.f32 %v2042_v14, %v895_v32 }
 0x1b0   : > { %v1049_v63 = vadd.f32 %v1039_v62, %v2044_v18 }
 0x1b2   : > { %1400 = vst [vmem:[%s2049_s24 + $0xd8] sm:$0xff] %v1049_v63  ;;  %1375 = vmatmul.msk.bf16.gmra.mxu3 %vm364_vm0, %v737_v42  ;;  %v991_v42 = vadd.f32 %v2096_v13, %v981_v49 }
 0x1b3   : > { %v868_v39 = vpop.f32.mrf.mxu2 }
 0x1b4   : > { %1382 = vst [vmem:[%s2049_s24 + $0x58] sm:$0xff] %v991_v42  ;;  %v1007_v43 = vmul.f32 %v2154_v37, %v868_v39 }
 0x1b5   : > { %v898_v2 = vpop.f32.mrf.mxu3 }
 0x1b6   : > { %v1040_v5 = vmul.f32 %v2042_v14, %v898_v2  ;;  %v1017_v45 = vadd.f32 %v2156_v40, %v1007_v43 }
 0x1b8   : > { %v1050_v6 = vadd.f32 %v1040_v5, %v2044_v18  ;;  %1389 = vst [vmem:[%s2049_s24 + $0x80] sm:$0xff] %v1017_v45 }
 0x1ba   : > { %1401 = vst [vmem:[%s2049_s24 + $0xe0] sm:$0xff] %v1050_v6 }
 0x1bb   : > { %v870_v48 = vpop.f32.mrf.mxu2 }
 0x1bc   : > { %v1008_v52 = vmul.f32 %v2154_v37, %v870_v48 }
 0x1bd   : > { %v900_v53 = vpop.f32.mrf.mxu3 }
 0x1be   : > { %v1041_v8 = vmul.f32 %v2042_v14, %v900_v53  ;;  %v1018_v54 = vadd.f32 %v2156_v40, %v1008_v52 }
 0x1c0   : > { %v1051_v10 = vadd.f32 %v1041_v8, %v2044_v18  ;;  %1390 = vst [vmem:[%s2049_s24 + $0x88] sm:$0xff] %v1018_v54 }
 0x1c2   : > { %1402 = vst [vmem:[%s2049_s24 + $0xe8] sm:$0xff] %v1051_v10  ;;  %1376 = vmatmul.msk.bf16.gmra.mxu3 %vm364_vm0, %v738_v55  ;;  %v993_v55 = vadd.f32 %v2096_v13, %v983_v4 }
 0x1c4   : > { %1384 = vst [vmem:[%s2049_s24 + $0x68] sm:$0xff] %v993_v55 }
 0x1c5   : > { %v903_v16 = vpop.f32.mrf.mxu3  ;;  %v873_v56 = vpop.f32.mrf.mxu2 }
 0x1c6   : > { %v1042_v19 = vmul.f32 %v2042_v14, %v903_v16  ;;  %v1009_v58 = vmul.f32 %v2154_v37, %v873_v56 }
 0x1c8   : > { %v1052_v20 = vadd.f32 %v1042_v19, %v2044_v18  ;;  %v1019_v60 = vadd.f32 %v2156_v40, %v1009_v58 }
 0x1ca   : > { %1403 = vst [vmem:[%s2049_s24 + $0xf0] sm:$0xff] %v1052_v20 }
 0x1cb   : > { %1391 = vst [vmem:[%s2049_s24 + $0x90] sm:$0xff] %v1019_v60 }
 0x1cd   : > { %v905_v51 = vpop.f32.mrf.mxu3  ;;  %v875_v31 = vpop.f32.mrf.mxu2 }
 0x1ce   : > { %v1043_v22 = vmul.f32 %v2042_v14, %v905_v51  ;;  %v985_v14 = vmul.f32 %v2094_v12, %v865_v33  ;;  %v1010_v61 = vmul.f32 %v2154_v37, %v875_v31 }
 0x1d0   : > { %v1053_v23 = vadd.f32 %v1043_v22, %v2044_v18  ;;  %v995_v34 = vadd.f32 %v2096_v13, %v985_v14  ;;  %v1020_v63 = vadd.f32 %v2156_v40, %v1010_v61 }
 0x1d2   : > { %1404 = vst [vmem:[%s2049_s24 + $0xf8] sm:$0xff] %v1053_v23 }
 0x1d3   : > { %1386 = vst [vmem:[%s2049_s24 + $0x78] sm:$0xff] %v995_v34 }
 0x1d4   : > { %1392 = vst [vmem:[%s2049_s24 + $0x98] sm:$0xff] %v1020_v63 }
 0x1d5   : > { %v908_v26 = vpop.f32.mrf.mxu3 }
 0x1d6   : > { %v1065_v29 = vmul.f32 %v2094_v12, %v908_v26 }
 0x1d8   : > { %v1075_v30 = vadd.f32 %v1065_v29, %v2096_v13 }
 0x1da   : > { %1407 = vst [vmem:[%s2049_s24 + $0x100] sm:$0xff] %v1075_v30 }
 0x1dc   : > { %v878_v1 = vpop.f32.mrf.mxu2 }
 0x1dd   : > { %v910_v18 = vpop.f32.mrf.mxu3  ;;  %v1011_v3 = vmul.f32 %v2154_v37, %v878_v1 }
 0x1de   : > { %v1066_v35 = vmul.f32 %v2094_v12, %v910_v18 }
 0x1df   : > { %v1021_v6 = vadd.f32 %v2156_v40, %v1011_v3 }
 0x1e0   : > { %v1076_v36 = vadd.f32 %v1066_v35, %v2096_v13 }
 0x1e1   : > { %1393 = vst [vmem:[%s2049_s24 + $0xa0] sm:$0xff] %v1021_v6 }
 0x1e2   : > { %1408 = vst [vmem:[%s2049_s24 + $0x108] sm:$0xff] %v1076_v36 }
 0x1e4   : > { %v880_v49 = vpop.f32.mrf.mxu2 }
 0x1e5   : > { %v913_v38 = vpop.f32.mrf.mxu3  ;;  %v1012_v42 = vmul.f32 %v2154_v37, %v880_v49 }
 0x1e6   : > { %v1067_v41 = vmul.f32 %v2094_v12, %v913_v38 }
 0x1e7   : > { %v1022_v10 = vadd.f32 %v2156_v40, %v1012_v42 }
 0x1e8   : > { %v1077_v44 = vadd.f32 %v1067_v41, %v2096_v13 }
 0x1e9   : > { %1394 = vst [vmem:[%s2049_s24 + $0xa8] sm:$0xff] %v1022_v10 }
 0x1ea   : > { %1409 = vst [vmem:[%s2049_s24 + $0x110] sm:$0xff] %v1077_v44 }
 0x1ec   : > { %v883_v15 = vpop.f32.mrf.mxu2 }
 0x1ed   : > { %v915_v47 = vpop.f32.mrf.mxu3  ;;  %v1013_v17 = vmul.f32 %v2154_v37, %v883_v15 }
 0x1ee   : > { %v1068_v50 = vmul.f32 %v2094_v12, %v915_v47 }
 0x1f0   : > { %v1078_v46 = vadd.f32 %v1068_v50, %v2096_v13 }
 0x1f2   : > { %1410 = vst [vmem:[%s2049_s24 + $0x118] sm:$0xff] %v1078_v46 }
 0x1f4   : > { %v885_v20 = vpop.f32.mrf.mxu2 }
 0x1f5   : > { %v918_v9 = vpop.f32.mrf.mxu3  ;;  %v1014_v4 = vmul.f32 %v2154_v37, %v885_v20 }
 0x1f6   : > { %v1069_v57 = vmul.f32 %v2094_v12, %v918_v9 }
 0x1f7   : > { %v1024_v55 = vadd.f32 %v2156_v40, %v1014_v4 }
 0x1f8   : > { %v1079_v59 = vadd.f32 %v1069_v57, %v2096_v13 }
 0x1f9   : > { %1396 = vst [vmem:[%s2049_s24 + $0xb8] sm:$0xff] %v1024_v55 }
 0x1fa   : > { %1411 = vst [vmem:[%s2049_s24 + $0x120] sm:$0xff] %v1079_v59 }
 0x1fd   : > { %v920_v28 = vpop.f32.mrf.mxu3 }
 0x1fe   : > { %v1070_v32 = vmul.f32 %v2094_v12, %v920_v28 }
 0x200   : > { %v1080_v62 = vadd.f32 %v1070_v32, %v2096_v13 }
 0x202   : > { %1412 = vst [vmem:[%s2049_s24 + $0x128] sm:$0xff] %v1080_v62 }
 0x205   : > { %v923_v0 = vpop.f32.mrf.mxu3 }
 0x206   : > { %v1071_v2 = vmul.f32 %v2094_v12, %v923_v0 }
 0x208   : > { %v1081_v5 = vadd.f32 %v1071_v2, %v2096_v13 }
 0x20a   : > { %1413 = vst [vmem:[%s2049_s24 + $0x130] sm:$0xff] %v1081_v5 }
 0x20d   : > { %v925_v7 = vpop.f32.mrf.mxu3 }
 0x20e   : > { %v1072_v53 = vmul.f32 %v2094_v12, %v925_v7  ;;  %v1023_v12 = vadd.f32 %v2156_v40, %v1013_v17 }
 0x210   : > { %v1082_v8 = vadd.f32 %v1072_v53, %v2096_v13  ;;  %1395 = vst [vmem:[%s2049_s24 + $0xb0] sm:$0xff] %v1023_v12 }
 0x212   : > { %1414 = vst [vmem:[%s2049_s24 + $0x138] sm:$0xff] %v1082_v8 }
 0x215   : > { %v928_v11 = vpop.f32.mrf.mxu3 }
 0x216   : > { %v1094_v16 = vmul.f32 %v2154_v37, %v928_v11 }
 0x218   : > { %v1104_v19 = vadd.f32 %v1094_v16, %v2156_v40 }
 0x21a   : > { %1417 = vst [vmem:[%s2049_s24 + $0x140] sm:$0xff] %v1104_v19 }
 0x21d   : > { %v930_v13 = vpop.f32.mrf.mxu3 }
 0x21e   : > { %v1095_v21 = vmul.f32 %v2154_v37, %v930_v13 }
 0x220   : > { %v1105_v51 = vadd.f32 %v1095_v21, %v2156_v40 }
 0x222   : > { %1418 = vst [vmem:[%s2049_s24 + $0x148] sm:$0xff] %v1105_v51 }
 0x225   : > { %v933_v22 = vpop.f32.mrf.mxu3 }
 0x226   : > { %v1096_v23 = vmul.f32 %v2154_v37, %v933_v22 }
 0x228   : > { %v1106_v24 = vadd.f32 %v1096_v23, %v2156_v40 }
 0x22a   : > { %1419 = vst [vmem:[%s2049_s24 + $0x150] sm:$0xff] %v1106_v24 }
 0x22d   : > { %v935_v25 = vpop.f32.mrf.mxu3 }
 0x22e   : > { %v1097_v26 = vmul.f32 %v2154_v37, %v935_v25 }
 0x230   : > { %v1107_v27 = vadd.f32 %v1097_v26, %v2156_v40 }
 0x232   : > { %1420 = vst [vmem:[%s2049_s24 + $0x158] sm:$0xff] %v1107_v27 }
 0x235   : > { %v938_v29 = vpop.f32.mrf.mxu3 }
 0x236   : > { %v1098_v30 = vmul.f32 %v2154_v37, %v938_v29 }
 0x238   : > { %v1108_v33 = vadd.f32 %v1098_v30, %v2156_v40 }
 0x23a   : > { %1421 = vst [vmem:[%s2049_s24 + $0x160] sm:$0xff] %v1108_v33 }
 0x23d   : > { %v940_v14 = vpop.f32.mrf.mxu3 }
 0x23e   : > { %v1099_v18 = vmul.f32 %v2154_v37, %v940_v14 }
 0x240   : > { %v1109_v34 = vadd.f32 %v1099_v18, %v2156_v40 }
 0x242   : > { %1422 = vst [vmem:[%s2049_s24 + $0x168] sm:$0xff] %v1109_v34 }
 0x245   : > { %v943_v35 = vpop.f32.mrf.mxu3 }
 0x246   : > { %v1100_v36 = vmul.f32 %v2154_v37, %v943_v35 }
 0x248   : > { %v1110_v38 = vadd.f32 %v1100_v36, %v2156_v40 }
 0x24a   : > { %1423 = vst [vmem:[%s2049_s24 + $0x170] sm:$0xff] %v1110_v38 }
 0x24d   : > { %v945_v39 = vpop.f32.mrf.mxu3 }
 0x24e   : > { %v1101_v41 = vmul.f32 %v2154_v37, %v945_v39 }
 0x250   : > { %v1111_v43 = vadd.f32 %v1101_v41, %v2156_v40 }
 0x252   : > { %1424 = vst [vmem:[%s2049_s24 + $0x178] sm:$0xff] %v1111_v43 }
 0x253   : > { %s1435_s10 = sshll.u32 %s1740_s21, 6  ;;  %s1147_s11 = sshll.u32 %s2049_s24, 4  ;;  %s1148_s11 = int_to_ptr.vmem [resolvable:$true] %s1147_s11 }
 0x254   : > { %s1136_s14 = scalar_lea.hbm %s2272_s5, %s1435_s10  ;;  %s1758_s28 = smov 1024  }
 0x255   : > { %s1149_s17 = sshll.u32 %s1136_s14, 4  ;;  %1457 = sst [smem:[#allocation14]] (%p1894_p7), %s1758_s28  ;;  %s1150_s17 = int_to_ptr.hbm [resolvable:$true] %s1149_s17 }
 0x256   : > { %s1759_s16 = smov 2048   ;;  %s1760_s29 = smov 8  }
 0x257   : > { %1458 = sst [smem:[#allocation14 + $0x1]] (%p1894_p7), %s1759_s16  ;;  %s1761_s0 = smov 128  }
 0x258   : > { %1459 = sst [smem:[#allocation14 + $0x2]] (%p1894_p7), %s1760_s29  ;;  %s1762_s21 = smov [#allocation13]  }
 0x259   : > { %1460 = sst [smem:[#allocation14 + $0x3]] (%p1894_p7), %s1761_s0  ;;  %s1763_s2 = smov 0  }
 0x25a   : > { %1461 = sst [smem:[#allocation14 + $0x4]] (%p1894_p7), %s1761_s0 }
 0x25b   : > { %1462 = sst [smem:[#allocation14 + $0x5]] (%p1894_p7), %s1760_s29 }
 0x25c   : > { %1463 = dma.general (%p1894_p7), %s1148_s11, 6144, %s1150_s17, %s1122_s8, %s1762_s21, [#allocation14], %s1763_s2, 0  }
 0x25d PF: > { %s1177_s3 = sand.u32 1, %s1728_s18   ;;  %p1483_p1 = pnand %p1299_p11, %p1839_p6 }
 0x25e   : > { %s1178_s24 = scalar_lea.sflag [#allocation4], %s1177_s3 }
 0x25f   : > { %p1484_p4 = pneg %p1483_p1 }
 0x261   : > { %1723 = dma.done.wait (%p1484_p4), %s1178_s24, 6144  }
 0x262   : > { %1725 = vsyncadd (%p1484_p4), %s1178_s24, 4294961152  ;;  %s24_s23 = sadd.s32 1, %s1748_s23   ;;  %s2289_s18 = smov %s1732_s19 }
 0x263   : > { %p21_p8 = scmp.ge.s32.totalorder %s24_s23, 4   ;;  %s2290_s19 = smov %s1736_s20 }
 0x264   : > { %s2291_s20 = smov %s1904_s30  ;;  %s2292_s21 = smov %s1744_s22 }
 0x265   : > { %s2293_s22 = smov %s2295_s12  ;;  %23 = sbr.rel (!%p21_p8) target bundleno = 13 (0xd), region = 119 }
 0x26a   :  { %1184 = vsyncpa [#allocation3], 1 }
 0x26b   :  { %1186 = vsyncpa [#allocation3 + $0x1], 1 }
 0x26c   :  { %1187 = vsyncpa [#allocation7], 1 }
 0x26d   :  { %1189 = vsyncpa [#allocation7 + $0x1], 1 }
 0x26e   :  { %1190 = vsyncpa [#allocation4], 1 }
 0x26f   :  { %1192 = vsyncpa [#allocation4 + $0x1], 1 }
 0x270   :  { %1193 = vsyncpa [#allocation5], 1 }
 0x271   :  { %1195 = vsyncpa [#allocation5 + $0x1], 1 }
 0x272   :  { %1196 = vsyncpa [#allocation11], 1 }

</bundles_post_ra>
